<compile_context>
chip_gen: v7x
topology: tpu7x:2x2x1
jax: 0.10.0
libtpu: 0.0.40
codegen_flags: <defaults>
</compile_context>

<pallas_src>
import jax
import jax.numpy as jnp
from jax.experimental import pallas as pl
from jax.experimental.pallas import tpu as pltpu

LANE = 128      # lane width (last dim)
SUBLANE = 8     # f32 sublane width (second-to-last dim)


def _round_up(x, m):
    return (x + m - 1) // m * m


def mlp_kernel(x_ref, w1_ref, b1_ref, w2_ref, b2_ref, w3_ref, b3_ref,
               w4_ref, b4_ref, o_ref):
    """One batch tile: 4 chained (matmul + bias), sigmoid on the first 3."""

    def linear(h_f32, w_ref, b_ref):
        # bf16 operands on the MXU, f32 accumulation, f32 bias add.
        y = jnp.dot(h_f32.astype(jnp.bfloat16), w_ref[...],
                    preferred_element_type=jnp.float32)
        return y + b_ref[...]

    h = jax.nn.sigmoid(linear(x_ref[...], w1_ref, b1_ref))
    h = jax.nn.sigmoid(linear(h, w2_ref, b2_ref))
    h = jax.nn.sigmoid(linear(h, w3_ref, b3_ref))
    o_ref[...] = linear(h, w4_ref, b4_ref).astype(o_ref.dtype)


def mlp_forward(x, params, *, batch_tile=256):
    """x: (B, in_fea) f32. params: f32 (in, out) weights and (1, out) biases."""
    B, in_fea = x.shape
    n_hidden = params["w1"].shape[1]
    out_fea = params["w4"].shape[1]

    # Lane-dense padded feature dims; sublane-aligned batch tile.
    in_p = _round_up(in_fea, LANE)
    h_p = _round_up(n_hidden, LANE)
    out_p = _round_up(out_fea, LANE)
    tb = min(batch_tile, _round_up(B, SUBLANE))
    b_p = _round_up(B, tb)
    grid = (b_p // tb,)

    # Zero-pad inputs / params (exact for the valid output slice).
    x_p = jnp.pad(x, ((0, b_p - B), (0, in_p - in_fea)))

    def pad_w(w, rp, cp):
        r, c = w.shape
        return jnp.pad(w, ((0, rp - r), (0, cp - c))).astype(jnp.bfloat16)

    def pad_b(b, cp):
        return jnp.pad(b, ((0, 0), (0, cp - b.shape[1]))).astype(jnp.float32)

    w1, b1 = pad_w(params["w1"], in_p, h_p), pad_b(params["b1"], h_p)
    w2, b2 = pad_w(params["w2"], h_p, h_p), pad_b(params["b2"], h_p)
    w3, b3 = pad_w(params["w3"], h_p, h_p), pad_b(params["b3"], h_p)
    w4, b4 = pad_w(params["w4"], h_p, out_p), pad_b(params["b4"], out_p)

    x_spec = pl.BlockSpec((tb, in_p), lambda i: (i, 0))
    out_spec = pl.BlockSpec((tb, out_p), lambda i: (i, 0))
    const = lambda shape: pl.BlockSpec(shape, lambda i: (0, 0))  # VMEM-resident

    flops = 2 * b_p * (in_p * h_p + 2 * h_p * h_p + h_p * out_p)
    transcendentals = 3 * b_p * h_p
    bytes_accessed = (
        x_p.size * 4 + b_p * out_p * 4
        + sum(int(a.size) * 2 for a in (w1, w2, w3, w4))
        + sum(int(a.size) * 4 for a in (b1, b2, b3, b4)))

    out = pl.pallas_call(
        mlp_kernel,
        out_shape=jax.ShapeDtypeStruct((b_p, out_p), jnp.float32),
        grid=grid,
        in_specs=[
            x_spec,
            const((in_p, h_p)), const((1, h_p)),
            const((h_p, h_p)), const((1, h_p)),
            const((h_p, h_p)), const((1, h_p)),
            const((h_p, out_p)), const((1, out_p)),
        ],
        out_specs=out_spec,
        compiler_params=pltpu.CompilerParams(
            dimension_semantics=("parallel",)),
        cost_estimate=pl.CostEstimate(
            flops=int(flops),
            transcendentals=int(transcendentals),
            bytes_accessed=int(bytes_accessed)),
    )(x_p, w1, b1, w2, b2, w3, b3, w4, b4)

    # Strip batch / feature padding.
    return out[:B, :out_fea]


def init_params(key, in_fea, n_hidden, out_fea):
    """Mimics PyTorch Linear init: U(-1/sqrt(fan_in), +1/sqrt(fan_in))."""
    dims = [(in_fea, n_hidden), (n_hidden, n_hidden),
            (n_hidden, n_hidden), (n_hidden, out_fea)]
    params = {}
    for i, (fan_in, fan_out) in enumerate(dims, start=1):
        key, kw, kb = jax.random.split(key, 3)
        bound = 1.0 / (fan_in ** 0.5)
        # stored as (in, out) = transpose of PyTorch's (out, in)
        params[f"w{i}"] = jax.random.uniform(
            kw, (fan_in, fan_out), jnp.float32, -bound, bound)
        params[f"b{i}"] = jax.random.uniform(
            kb, (1, fan_out), jnp.float32, -bound, bound)
    return params


def mlp_reference(x, params, use_bf16=True):
    """Pure-JAX reference. use_bf16=True mirrors the kernel's MXU dtype."""
    def lin(h, w, b):
        if use_bf16:
            h = h.astype(jnp.bfloat16)
            w = w.astype(jnp.bfloat16)
        return jnp.dot(h, w, preferred_element_type=jnp.float32) + b

    h = jax.nn.sigmoid(lin(x, params["w1"], params["b1"]))
    h = jax.nn.sigmoid(lin(h, params["w2"], params["b2"]))
    h = jax.nn.sigmoid(lin(h, params["w3"], params["b3"]))
    return lin(h, params["w4"], params["b4"])


if __name__ == "__main__":
    in_fea, n_hidden, out_fea = 16, 32, 8
    batch = 8

    key = jax.random.PRNGKey(0)
    key, kx = jax.random.split(key)
    x = jax.random.normal(kx, (batch, in_fea), jnp.float32)
    params = init_params(key, in_fea, n_hidden, out_fea)

    out = jax.block_until_ready(mlp_forward(x, params))
    assert out.shape == (batch, out_fea)
    assert bool(jnp.all(jnp.isfinite(out)))

    # Tight check vs a reference with identical bf16-operand / f32-accum math.
    ref_bf16 = mlp_reference(x, params, use_bf16=True)
    assert jnp.allclose(out, ref_bf16, atol=2e-3, rtol=2e-3), (
        float(jnp.max(jnp.abs(out - ref_bf16))))

    # Sanity check vs the pure-f32 PyTorch-equivalent forward.
    ref_f32 = mlp_reference(x, params, use_bf16=False)
    assert float(jnp.max(jnp.abs(out - ref_f32))) < 1e-1

    print("KERNEL_OK")
</pallas_src>

<mosaic_0001>
module attributes {stable_mosaic.version = 11 : i64} {
  func.func @mlp_kernel(%arg0: i32, %arg1: memref<8x128xf32, #tpu.memory_space<vmem>>, %arg2: memref<128x128xbf16, #tpu.memory_space<vmem>>, %arg3: memref<1x128xf32, #tpu.memory_space<vmem>>, %arg4: memref<128x128xbf16, #tpu.memory_space<vmem>>, %arg5: memref<1x128xf32, #tpu.memory_space<vmem>>, %arg6: memref<128x128xbf16, #tpu.memory_space<vmem>>, %arg7: memref<1x128xf32, #tpu.memory_space<vmem>>, %arg8: memref<128x128xbf16, #tpu.memory_space<vmem>>, %arg9: memref<1x128xf32, #tpu.memory_space<vmem>>, %arg10: memref<8x128xf32, #tpu.memory_space<vmem>>) attributes {dimension_semantics = [#tpu.dimension_semantics<parallel>], iteration_bounds = array<i64: 1>, scalar_prefetch = 0 : i64, scratch_operands = 0 : i64, tpu.core_type = #tpu.core_type<tc>, window_params = [{transform_indices = @transform_0, window_bounds = array<i64: 8, 128>}, {pipeline_mode = #tpu.pipeline_mode<synchronous>, transform_indices = @transform_1, window_bounds = array<i64: 128, 128>}, {pipeline_mode = #tpu.pipeline_mode<synchronous>, transform_indices = @transform_2, window_bounds = array<i64: 1, 128>}, {pipeline_mode = #tpu.pipeline_mode<synchronous>, transform_indices = @transform_3, window_bounds = array<i64: 128, 128>}, {pipeline_mode = #tpu.pipeline_mode<synchronous>, transform_indices = @transform_4, window_bounds = array<i64: 1, 128>}, {pipeline_mode = #tpu.pipeline_mode<synchronous>, transform_indices = @transform_5, window_bounds = array<i64: 128, 128>}, {pipeline_mode = #tpu.pipeline_mode<synchronous>, transform_indices = @transform_6, window_bounds = array<i64: 1, 128>}, {pipeline_mode = #tpu.pipeline_mode<synchronous>, transform_indices = @transform_7, window_bounds = array<i64: 128, 128>}, {pipeline_mode = #tpu.pipeline_mode<synchronous>, transform_indices = @transform_8, window_bounds = array<i64: 1, 128>}, {transform_indices = @transform_9, window_bounds = array<i64: 8, 128>}]} {
    %c0 = arith.constant 0 : index
    %c0_0 = arith.constant 0 : index
    %0 = vector.load %arg1[%c0, %c0_0] : memref<8x128xf32, #tpu.memory_space<vmem>>, vector<8x128xf32>
    %1 = arith.truncf %0 : vector<8x128xf32> to vector<8x128xbf16>
    %c0_1 = arith.constant 0 : index
    %c0_2 = arith.constant 0 : index
    %2 = vector.load %arg2[%c0_1, %c0_2] : memref<128x128xbf16, #tpu.memory_space<vmem>>, vector<128x128xbf16>
    %cst = arith.constant dense<0.000000e+00> : vector<8x128xf32>
    %3 = tpu.matmul %1, %2, %cst {dimension_numbers = #tpu.dot_dimension_numbers<[1], [0], [0], [1], [0, 0, 1, 1], [], []>} : vector<8x128xbf16>, vector<128x128xbf16>, vector<8x128xf32> -> vector<8x128xf32>
    %c0_3 = arith.constant 0 : index
    %c0_4 = arith.constant 0 : index
    %4 = vector.load %arg3[%c0_3, %c0_4] : memref<1x128xf32, #tpu.memory_space<vmem>>, vector<1x128xf32>
    %5 = vector.broadcast %4 : vector<1x128xf32> to vector<8x128xf32>
    %6 = arith.addf %3, %5 : vector<8x128xf32>
    %7 = arith.negf %6 : vector<8x128xf32>
    %8 = math.exp %7 : vector<8x128xf32>
    %cst_5 = arith.constant 1.000000e+00 : f32
    %9 = vector.broadcast %cst_5 : f32 to vector<8x128xf32>
    %10 = arith.addf %9, %8 : vector<8x128xf32>
    %11 = arith.divf %9, %10 : vector<8x128xf32>
    %12 = arith.truncf %11 : vector<8x128xf32> to vector<8x128xbf16>
    %c0_6 = arith.constant 0 : index
    %c0_7 = arith.constant 0 : index
    %13 = vector.load %arg4[%c0_6, %c0_7] : memref<128x128xbf16, #tpu.memory_space<vmem>>, vector<128x128xbf16>
    %cst_8 = arith.constant dense<0.000000e+00> : vector<8x128xf32>
    %14 = tpu.matmul %12, %13, %cst_8 {dimension_numbers = #tpu.dot_dimension_numbers<[1], [0], [0], [1], [0, 0, 1, 1], [], []>} : vector<8x128xbf16>, vector<128x128xbf16>, vector<8x128xf32> -> vector<8x128xf32>
    %c0_9 = arith.constant 0 : index
    %c0_10 = arith.constant 0 : index
    %15 = vector.load %arg5[%c0_9, %c0_10] : memref<1x128xf32, #tpu.memory_space<vmem>>, vector<1x128xf32>
    %16 = vector.broadcast %15 : vector<1x128xf32> to vector<8x128xf32>
    %17 = arith.addf %14, %16 : vector<8x128xf32>
    %18 = arith.negf %17 : vector<8x128xf32>
    %19 = math.exp %18 : vector<8x128xf32>
    %cst_11 = arith.constant 1.000000e+00 : f32
    %20 = vector.broadcast %cst_11 : f32 to vector<8x128xf32>
    %21 = arith.addf %20, %19 : vector<8x128xf32>
    %22 = arith.divf %20, %21 : vector<8x128xf32>
    %23 = arith.truncf %22 : vector<8x128xf32> to vector<8x128xbf16>
    %c0_12 = arith.constant 0 : index
    %c0_13 = arith.constant 0 : index
    %24 = vector.load %arg6[%c0_12, %c0_13] : memref<128x128xbf16, #tpu.memory_space<vmem>>, vector<128x128xbf16>
    %cst_14 = arith.constant dense<0.000000e+00> : vector<8x128xf32>
    %25 = tpu.matmul %23, %24, %cst_14 {dimension_numbers = #tpu.dot_dimension_numbers<[1], [0], [0], [1], [0, 0, 1, 1], [], []>} : vector<8x128xbf16>, vector<128x128xbf16>, vector<8x128xf32> -> vector<8x128xf32>
    %c0_15 = arith.constant 0 : index
    %c0_16 = arith.constant 0 : index
    %26 = vector.load %arg7[%c0_15, %c0_16] : memref<1x128xf32, #tpu.memory_space<vmem>>, vector<1x128xf32>
    %27 = vector.broadcast %26 : vector<1x128xf32> to vector<8x128xf32>
    %28 = arith.addf %25, %27 : vector<8x128xf32>
    %29 = arith.negf %28 : vector<8x128xf32>
    %30 = math.exp %29 : vector<8x128xf32>
    %cst_17 = arith.constant 1.000000e+00 : f32
    %31 = vector.broadcast %cst_17 : f32 to vector<8x128xf32>
    %32 = arith.addf %31, %30 : vector<8x128xf32>
    %33 = arith.divf %31, %32 : vector<8x128xf32>
    %34 = arith.truncf %33 : vector<8x128xf32> to vector<8x128xbf16>
    %c0_18 = arith.constant 0 : index
    %c0_19 = arith.constant 0 : index
    %35 = vector.load %arg8[%c0_18, %c0_19] : memref<128x128xbf16, #tpu.memory_space<vmem>>, vector<128x128xbf16>
    %cst_20 = arith.constant dense<0.000000e+00> : vector<8x128xf32>
    %36 = tpu.matmul %34, %35, %cst_20 {dimension_numbers = #tpu.dot_dimension_numbers<[1], [0], [0], [1], [0, 0, 1, 1], [], []>} : vector<8x128xbf16>, vector<128x128xbf16>, vector<8x128xf32> -> vector<8x128xf32>
    %c0_21 = arith.constant 0 : index
    %c0_22 = arith.constant 0 : index
    %37 = vector.load %arg9[%c0_21, %c0_22] : memref<1x128xf32, #tpu.memory_space<vmem>>, vector<1x128xf32>
    %38 = vector.broadcast %37 : vector<1x128xf32> to vector<8x128xf32>
    %39 = arith.addf %36, %38 : vector<8x128xf32>
    %c0_23 = arith.constant 0 : index
    %c0_24 = arith.constant 0 : index
    %40 = vector.load %arg10[%c0_23, %c0_24] : memref<8x128xf32, #tpu.memory_space<vmem>>, vector<8x128xf32>
    tpu.vector_store %arg10[%c0_23, %c0_24], %39 {strides = array<i32>} : memref<8x128xf32, #tpu.memory_space<vmem>>, vector<8x128xf32>,
    return
  }
  func.func @transform_0(%arg0: i32) -> (i32, i32) {
    %c0_i32 = arith.constant 0 : i32
    %c0_i32_0 = arith.constant 0 : i32
    return %arg0, %c0_i32 : i32, i32
  }
  func.func @transform_1(%arg0: i32) -> (i32, i32) {
    %c0_i32 = arith.constant 0 : i32
    %c0_i32_0 = arith.constant 0 : i32
    %c0_i32_1 = arith.constant 0 : i32
    return %c0_i32, %c0_i32_0 : i32, i32
  }
  func.func @transform_2(%arg0: i32) -> (i32, i32) {
    %c0_i32 = arith.constant 0 : i32
    %c0_i32_0 = arith.constant 0 : i32
    %c0_i32_1 = arith.constant 0 : i32
    return %c0_i32, %c0_i32_0 : i32, i32
  }
  func.func @transform_3(%arg0: i32) -> (i32, i32) {
    %c0_i32 = arith.constant 0 : i32
    %c0_i32_0 = arith.constant 0 : i32
    %c0_i32_1 = arith.constant 0 : i32
    return %c0_i32, %c0_i32_0 : i32, i32
  }
  func.func @transform_4(%arg0: i32) -> (i32, i32) {
    %c0_i32 = arith.constant 0 : i32
    %c0_i32_0 = arith.constant 0 : i32
    %c0_i32_1 = arith.constant 0 : i32
    return %c0_i32, %c0_i32_0 : i32, i32
  }
  func.func @transform_5(%arg0: i32) -> (i32, i32) {
    %c0_i32 = arith.constant 0 : i32
    %c0_i32_0 = arith.constant 0 : i32
    %c0_i32_1 = arith.constant 0 : i32
    return %c0_i32, %c0_i32_0 : i32, i32
  }
  func.func @transform_6(%arg0: i32) -> (i32, i32) {
    %c0_i32 = arith.constant 0 : i32
    %c0_i32_0 = arith.constant 0 : i32
    %c0_i32_1 = arith.constant 0 : i32
    return %c0_i32, %c0_i32_0 : i32, i32
  }
  func.func @transform_7(%arg0: i32) -> (i32, i32) {
    %c0_i32 = arith.constant 0 : i32
    %c0_i32_0 = arith.constant 0 : i32
    %c0_i32_1 = arith.constant 0 : i32
    return %c0_i32, %c0_i32_0 : i32, i32
  }
  func.func @transform_8(%arg0: i32) -> (i32, i32) {
    %c0_i32 = arith.constant 0 : i32
    %c0_i32_0 = arith.constant 0 : i32
    %c0_i32_1 = arith.constant 0 : i32
    return %c0_i32, %c0_i32_0 : i32, i32
  }
  func.func @transform_9(%arg0: i32) -> (i32, i32) {
    %c0_i32 = arith.constant 0 : i32
    %c0_i32_0 = arith.constant 0 : i32
    return %arg0, %c0_i32 : i32, i32
  }
}

</mosaic_0001>

<bundles_post_ra>
// kernel: tpu_custom_call.1
= control target key start
LH: loop header
LB: loop body
LE: loop exit
PB: predicated region body
PF: predicated region fallthrough
CT: control target
= control target key end

     0   :  { %14 = vsyncpa [#allocation3], 0  ;;  %s1130_s0 = inlined_call_operand.hbm [shape: f32[8,128], index: 0, kind: input, shape index: {}]   ;;  %s1131_s1 = inlined_call_operand.hbm [shape: bf16[128,128], index: 1, kind: input, shape index: {}]   ;;  %s1132_s2 = inlined_call_operand.vmem [shape: f32[1,128], index: 2, kind: input, shape index: {}]   ;;  %s1133_s3 = inlined_call_operand.hbm [shape: bf16[128,128], index: 3, kind: input, shape index: {}]   ;;  %s1134_s4 = inlined_call_operand.vmem [shape: f32[1,128], index: 4, kind: input, shape index: {}]   ;;  %s1135_s5 = inlined_call_operand.hbm [shape: bf16[128,128], index: 5, kind: input, shape index: {}]   ;;  %s1136_s6 = inlined_call_operand.vmem [shape: f32[1,128], index: 6, kind: input, shape index: {}]   ;;  %s1137_s7 = inlined_call_operand.hbm [shape: bf16[128,128], index: 7, kind: input, shape index: {}]   ;;  %s1138_s8 = inlined_call_operand.vmem [shape: f32[1,128], index: 8, kind: input, shape index: {}]   ;;  %s1139_s9 = inlined_call_operand.hbm [shape: f32[8,128], index: 9, kind: output, shape index: {}]  }
   0x1   :  { %15 = vsyncpa [#allocation6], 0 }
   0x2   :  { %16 = vsyncpa [#allocation9], 0 }
   0x3   :  { %17 = vsyncpa [#allocation4], 0  ;;  %s934_s30 = smov [#allocation5]   ;;  %s794_s13 = scalar_lea.hbm %s1131_s1, 1024 }
   0x4   :  { %s33_s10 = sshll.u32 %s934_s30, 4  ;;  %p795_p0 = scmp.ne.s32.totalorder %s1131_s1, %s794_s13  ;;  %s34_s10 = int_to_ptr.vmem [resolvable:$true] %s33_s10 }
   0x5   :  { %p798_p1 = scmp.lt.u32.totalorder %s794_s13, %s1131_s1 }
   0x7   :  { %p800_p2 = pnand %p798_p1, %p795_p0 }
   0x9   :  { %803 = shalt.err (!%p800_p2)
}
   0xa   :  { %s804_s18 = scalar_lea.vmem %s34_s10, 1024  ;;  %p809_p4 = scmp.lt.s32.totalorder %s34_s10, %s34_s10 }
   0xb   :  { %p805_p3 = scmp.ne.s32.totalorder %s34_s10, %s804_s18  ;;  %p810_p5 = scmp.lt.s32.totalorder %s804_s18, %s804_s18 }
   0xd   :  { %p811_p6 = por %p810_p5, %p809_p4 }
   0xf   :  { %p812_p7 = pnand %p811_p6, %p805_p3 }
  0x11   :  { %815 = shalt.err (!%p812_p7)
}
  0x12   :  { %s935_s19 = smov 64   ;;  %s936_s20 = smov 4  }
  0x13   :  { %39 = dma.hbm_to_vmem [thread:$0]  %s1131_s1, 1024, %s34_s10, [#allocation6], %s935_s19, %s935_s19, %s936_s20  }
  0x14   :  { %s937_s23 = smov [#allocation8]   ;;  %s938_s25 = smov [#allocation2]  }
  0x15   :  { %s61_s24 = sshll.u32 %s937_s23, 4  ;;  %s24_s26 = sshll.u32 %s938_s25, 4  ;;  %s62_s24 = int_to_ptr.vmem [resolvable:$true] %s61_s24  ;;  %s25_s26 = int_to_ptr.vmem [resolvable:$true] %s24_s26 }
  0x16   :  { %s816_s29 = scalar_lea.hbm %s1135_s5, 1024 }
  0x17   :  { %p817_p8 = scmp.ne.s32.totalorder %s1135_s5, %s816_s29  ;;  %p820_p9 = scmp.lt.u32.totalorder %s816_s29, %s1135_s5 }
  0x19   :  { %p822_p10 = pnand %p820_p9, %p817_p8 }
  0x1b   :  { %825 = shalt.err (!%p822_p10)
}
  0x1c   :  { %s826_s1 = scalar_lea.vmem %s62_s24, 1024  ;;  %p831_p12 = scmp.lt.s32.totalorder %s62_s24, %s62_s24 }
  0x1d   :  { %p827_p11 = scmp.ne.s32.totalorder %s62_s24, %s826_s1  ;;  %p832_p13 = scmp.lt.s32.totalorder %s826_s1, %s826_s1 }
  0x1f   :  { %p833_p0 = por %p832_p13, %p831_p12 }
  0x21   :  { %p834_p1 = pnand %p833_p0, %p827_p11 }
  0x23   :  { %837 = shalt.err (!%p834_p1)
}
  0x24   :  { %67 = dma.hbm_to_vmem [thread:$0]  %s1135_s5, 1024, %s62_s24, [#allocation9], %s935_s19, %s935_s19, %s936_s20  }
  0x25   :  { %s838_s17 = scalar_lea.hbm %s1130_s0, 128 }
  0x26   :  { %p839_p2 = scmp.ne.s32.totalorder %s1130_s0, %s838_s17  ;;  %p842_p3 = scmp.lt.u32.totalorder %s838_s17, %s1130_s0 }
  0x28   :  { %p844_p4 = pnand %p842_p3, %p839_p2 }
  0x2a   :  { %847 = shalt.err (!%p844_p4)
}
  0x2b   :  { %s848_s25 = scalar_lea.vmem %s25_s26, 128  ;;  %p853_p6 = scmp.lt.s32.totalorder %s25_s26, %s25_s26 }
  0x2c   :  { %p849_p5 = scmp.ne.s32.totalorder %s25_s26, %s848_s25  ;;  %p854_p7 = scmp.lt.s32.totalorder %s848_s25, %s848_s25 }
  0x2e   :  { %p855_p8 = por %p854_p7, %p853_p6 }
  0x30   :  { %p856_p9 = pnand %p855_p8, %p849_p5 }
  0x32   :  { %859 = shalt.err (!%p856_p9)
}
  0x33   :  { %27 = dma.hbm_to_vmem [thread:$0]  %s1130_s0, 128, %s25_s26, [#allocation3]  }
  0x34   :  { %s939_s27 = smov [#allocation7]   ;;  %s940_s29 = smov [#allocation10]  }
  0x35   :  { %s47_s28 = sshll.u32 %s939_s27, 4  ;;  %s75_s30 = sshll.u32 %s940_s29, 4  ;;  %s48_s28 = int_to_ptr.vmem [resolvable:$true] %s47_s28  ;;  %s76_s30 = int_to_ptr.vmem [resolvable:$true] %s75_s30 }
  0x36   :  { %s860_s13 = scalar_lea.hbm %s1133_s3, 1024 }
  0x37   :  { %p861_p10 = scmp.ne.s32.totalorder %s1133_s3, %s860_s13  ;;  %p864_p11 = scmp.lt.u32.totalorder %s860_s13, %s1133_s3 }
  0x39   :  { %p866_p12 = pnand %p864_p11, %p861_p10 }
  0x3b   :  { %869 = shalt.err (!%p866_p12)
}
  0x3c   :  { %s870_s0 = scalar_lea.vmem %s48_s28, 1024  ;;  %p875_p0 = scmp.lt.s32.totalorder %s48_s28, %s48_s28 }
  0x3d   :  { %p871_p13 = scmp.ne.s32.totalorder %s48_s28, %s870_s0  ;;  %p876_p1 = scmp.lt.s32.totalorder %s870_s0, %s870_s0 }
  0x3f   :  { %p877_p2 = por %p876_p1, %p875_p0 }
  0x41   :  { %p878_p3 = pnand %p877_p2, %p871_p13 }
  0x43   :  { %881 = shalt.err (!%p878_p3)
}
  0x44   :  { %53 = dma.hbm_to_vmem [thread:$0]  %s1133_s3, 1024, %s48_s28, [#allocation6], %s935_s19, %s935_s19, %s936_s20  }
  0x45   :  { %s882_s21 = scalar_lea.hbm %s1137_s7, 1024 }
  0x46   :  { %p883_p4 = scmp.ne.s32.totalorder %s1137_s7, %s882_s21  ;;  %p886_p5 = scmp.lt.u32.totalorder %s882_s21, %s1137_s7 }
  0x48   :  { %p888_p6 = pnand %p886_p5, %p883_p4 }
  0x4a   :  { %891 = shalt.err (!%p888_p6)
}
  0x4b   :  { %s892_s24 = scalar_lea.vmem %s76_s30, 1024  ;;  %p897_p8 = scmp.lt.s32.totalorder %s76_s30, %s76_s30 }
  0x4c   :  { %p893_p7 = scmp.ne.s32.totalorder %s76_s30, %s892_s24  ;;  %p898_p9 = scmp.lt.s32.totalorder %s892_s24, %s892_s24 }
  0x4e   :  { %p899_p10 = por %p898_p9, %p897_p8 }
  0x50   :  { %p900_p11 = pnand %p899_p10, %p893_p7 }
  0x52   :  { %903 = shalt.err (!%p900_p11)
}
  0x53   :  { %81 = dma.hbm_to_vmem [thread:$0]  %s1137_s7, 1024, %s76_s30, [#allocation9], %s935_s19, %s935_s19, %s936_s20  }
  0x54   :  { %926 = dma.done.wait [#allocation3], 128  }
  0x55   :  { %927 = vsyncadd [#allocation3], 4294967168 }
  0x56   :  { %928 = dma.done.wait [#allocation6], 2048  }
  0x57   :  { %929 = vsyncadd [#allocation6], 4294965248 }
  0x58   :  { %930 = dma.done.wait [#allocation9], 2048  }
  0x59   :  { %931 = vsyncadd [#allocation9], 4294965248  ;;  %v941_v0 = vmov 0.0   ;;  %vm942_vm0 = vmmov 0   ;;  %v750_v1 = vld [vmem:[#allocation5] sm:$0xff]   ;;  %v751_v2 = vld [vmem:[#allocation5 + $0x8] sm:$0xff]  }
  0x5a   :  { %660 = vmatprep.subr.bf16.mxu0 %v941_v0  ;;  %676 = vmatprep.mubr.msk.bf16.mxu0 %vm942_vm0, %v941_v0  ;;  %v752_v3 = vld [vmem:[#allocation5 + $0x10] sm:$0xff]   ;;  %v753_v4 = vld [vmem:[#allocation5 + $0x18] sm:$0xff]   ;;  %v754_v5 = vld [vmem:[#allocation5 + $0x20] sm:$0xff]   ;;  %s943_s11 = smov [#allocation11]  }
  0x5b   :  { %680 = vmatprep.subr.bf16.mxu1 %v941_v0  ;;  %696 = vmatprep.mubr.msk.bf16.mxu1 %vm942_vm0, %v941_v0  ;;  %v755_v6 = vld [vmem:[#allocation5 + $0x28] sm:$0xff]   ;;  %v756_v7 = vld [vmem:[#allocation5 + $0x30] sm:$0xff]   ;;  %v757_v8 = vld [vmem:[#allocation5 + $0x38] sm:$0xff]   ;;  %s574_s12 = sshll.u32 %s943_s11, 4  ;;  %s575_s12 = int_to_ptr.vmem [resolvable:$true] %s574_s12 }
  0x5c   :  { %661 = vmatpush3.bf16.msra.mxu0 %v750_v1  ;;  %v100_v9 = vld [vmem:[#allocation2] sm:$0xff]  ;;  %v758_v11 = vld [vmem:[#allocation7] sm:$0xff]   ;;  %v759_v12 = vld [vmem:[#allocation7 + $0x8] sm:$0xff]   ;;  %p909_p13 = scmp.lt.s32.totalorder %s575_s12, %s575_s12 }
  0x5d   :  { %662 = vmatprep.subr.bf16.mxu0 %v941_v0  ;;  %v101_v10 = vpack.c.bf16 %v100_v9, %v100_v9  ;;  %681 = vmatpush3.bf16.msra.mxu1 %v758_v11  ;;  %v760_v13 = vld [vmem:[#allocation7 + $0x10] sm:$0xff]   ;;  %v761_v14 = vld [vmem:[#allocation7 + $0x18] sm:$0xff]   ;;  %v762_v15 = vld [vmem:[#allocation7 + $0x20] sm:$0xff]  }
  0x5e   :  { %682 = vmatprep.subr.bf16.mxu1 %v941_v0  ;;  %v763_v16 = vld [vmem:[#allocation7 + $0x28] sm:$0xff]   ;;  %v764_v17 = vld [vmem:[#allocation7 + $0x30] sm:$0xff]   ;;  %v765_v18 = vld [vmem:[#allocation7 + $0x38] sm:$0xff]  }
  0x5f   :  { %v585_v19 = vld [vmem:[%s1132_s2] ss:$0 sm:$0xff]  ;;  %v766_v30 = vld [vmem:[#allocation8] sm:$0xff]   ;;  %v767_v31 = vld [vmem:[#allocation8 + $0x8] sm:$0xff]  }
  0x60   :  { %663 = vmatpush3.bf16.msra.mxu0 %v751_v2  ;;  %v768_v32 = vld [vmem:[#allocation8 + $0x10] sm:$0xff]   ;;  %v769_v33 = vld [vmem:[#allocation8 + $0x18] sm:$0xff]   ;;  %v770_v34 = vld [vmem:[#allocation8 + $0x20] sm:$0xff]  }
  0x61   :  { %664 = vmatprep.subr.bf16.mxu0 %v941_v0  ;;  %683 = vmatpush3.bf16.msra.mxu1 %v759_v12  ;;  %v771_v35 = vld [vmem:[#allocation8 + $0x28] sm:$0xff]   ;;  %v772_v36 = vld [vmem:[#allocation8 + $0x30] sm:$0xff]   ;;  %v773_v37 = vld [vmem:[#allocation8 + $0x38] sm:$0xff]  }
  0x62   :  { %684 = vmatprep.subr.bf16.mxu1 %v941_v0  ;;  %v595_v38 = vld [vmem:[%s1134_s4] ss:$0 sm:$0xff]  ;;  %v774_v49 = vld [vmem:[#allocation10] sm:$0xff]   ;;  %v775_v50 = vld [vmem:[#allocation10 + $0x8] sm:$0xff]  }
  0x63   :  { %v776_v51 = vld [vmem:[#allocation10 + $0x10] sm:$0xff]   ;;  %v777_v52 = vld [vmem:[#allocation10 + $0x18] sm:$0xff]   ;;  %v778_v53 = vld [vmem:[#allocation10 + $0x20] sm:$0xff]  }
  0x64   :  { %665 = vmatpush3.bf16.msra.mxu0 %v752_v3  ;;  %v779_v54 = vld [vmem:[#allocation10 + $0x28] sm:$0xff]   ;;  %v780_v55 = vld [vmem:[#allocation10 + $0x30] sm:$0xff]   ;;  %v781_v56 = vld [vmem:[#allocation10 + $0x38] sm:$0xff]  }
  0x65   :  { %666 = vmatprep.subr.bf16.mxu0 %v941_v0  ;;  %685 = vmatpush3.bf16.msra.mxu1 %v760_v13  ;;  %v605_v57 = vld [vmem:[%s1136_s6] ss:$0 sm:$0xff]  ;;  %s904_s6 = scalar_lea.vmem %s575_s12, 128 }
  0x66   :  { %686 = vmatprep.subr.bf16.mxu1 %v941_v0  ;;  %p905_p12 = scmp.ne.s32.totalorder %s575_s12, %s904_s6  ;;  %p910_p0 = scmp.lt.s32.totalorder %s904_s6, %s904_s6 }
  0x68   :  { %667 = vmatpush3.bf16.msra.mxu0 %v753_v4  ;;  %p911_p1 = por %p910_p0, %p909_p13 }
  0x69   :  { %668 = vmatprep.subr.bf16.mxu0 %v941_v0  ;;  %687 = vmatpush3.bf16.msra.mxu1 %v761_v14 }
  0x6a   :  { %688 = vmatprep.subr.bf16.mxu1 %v941_v0  ;;  %p912_p2 = pnand %p911_p1, %p905_p12 }
  0x6c   :  { %669 = vmatpush3.bf16.msra.mxu0 %v754_v5 }
  0x6d   :  { %670 = vmatprep.subr.bf16.mxu0 %v941_v0  ;;  %689 = vmatpush3.bf16.msra.mxu1 %v762_v15 }
  0x6e   :  { %690 = vmatprep.subr.bf16.mxu1 %v941_v0 }
  0x70   :  { %671 = vmatpush3.bf16.msra.mxu0 %v755_v6 }
  0x71   :  { %672 = vmatprep.subr.bf16.mxu0 %v941_v0  ;;  %691 = vmatpush3.bf16.msra.mxu1 %v763_v16 }
  0x72   :  { %692 = vmatprep.subr.bf16.mxu1 %v941_v0 }
  0x74   :  { %673 = vmatpush3.bf16.msra.mxu0 %v756_v7 }
  0x75   :  { %674 = vmatprep.subr.bf16.mxu0 %v941_v0  ;;  %693 = vmatpush3.bf16.msra.mxu1 %v764_v17 }
  0x76   :  { %694 = vmatprep.subr.bf16.mxu1 %v941_v0 }
  0x78   :  { %675 = vmatpush3.bf16.msra.mxu0 %v757_v8 }
  0x79   :  { %700 = vmatprep.subr.bf16.mxu0 %v941_v0  ;;  %695 = vmatpush3.bf16.msra.mxu1 %v765_v18 }
  0x7a   :  { %720 = vmatprep.subr.bf16.mxu1 %v941_v0 }
  0x7b   :  { %677 = vmatmul.mubr.bf16.vlgmr.msra.gmra.mrb[0].mxu0 %v101_v10 }
  0x7c   :  { %716 = vmatprep.mubr.msk.bf16.mxu0 %vm942_vm0, %v941_v0  ;;  %701 = vmatpush3.bf16.msra.mxu0 %v766_v30 }
  0x7d   :  { %702 = vmatprep.subr.bf16.mxu0 %v941_v0 }
  0x80   :  { %703 = vmatpush3.bf16.msra.mxu0 %v767_v31 }
  0x81   :  { %704 = vmatprep.subr.bf16.mxu0 %v941_v0 }
  0x84   :  { %705 = vmatpush3.bf16.msra.mxu0 %v768_v32 }
  0x85   :  { %706 = vmatprep.subr.bf16.mxu0 %v941_v0 }
  0x88   :  { %707 = vmatpush3.bf16.msra.mxu0 %v769_v33 }
  0x89   :  { %708 = vmatprep.subr.bf16.mxu0 %v941_v0 }
  0x8c   :  { %709 = vmatpush3.bf16.msra.mxu0 %v770_v34 }
  0x8d   :  { %710 = vmatprep.subr.bf16.mxu0 %v941_v0 }
  0x90   :  { %711 = vmatpush3.bf16.msra.mxu0 %v771_v35 }
  0x91   :  { %712 = vmatprep.subr.bf16.mxu0 %v941_v0 }
  0x94   :  { %713 = vmatpush3.bf16.msra.mxu0 %v772_v36 }
  0x95   :  { %714 = vmatprep.subr.bf16.mxu0 %v941_v0 }
  0x98   :  { %715 = vmatpush3.bf16.msra.mxu0 %v773_v37 }
 0x14e   :  { %v207_v20 = vpop.f32.mrb[0].mxu0 }
 0x14f   :  { %v208_v21 = vadd.f32 %v585_v19, %v207_v20  ;;  %v678_v22 = vpop.f32.mrb[1].mxu0 }
 0x150   :  { %v210_v23 = vpop.f32.mrb[2].mxu0 }
 0x151   :  { %v594_v24 = vmul.f32 -1.442695, %v208_v21  ;;  %v679_v25 = vpop.f32.mrb[3].mxu0 }
 0x153   :  { %782 = vpow2.f32 %v594_v24 }
 0x15d   :  { %v783_v26 = vpop.eup %782 }
 0x15e   :  { %v216_v27 = vadd.f32 1.0, %v783_v26 }
 0x160   :  { %784 = vrcp.f32 %v216_v27 }
 0x16a   :  { %v785_v28 = vpop.eup %784 }
 0x16b   :  { %v219_v29 = vpack.c.bf16 %v785_v28, %v785_v28 }
 0x16d   :  { %697 = vmatmul.mubr.bf16.vlgmr.msra.gmra.mrb[0].mxu1 %v219_v29 }
 0x16e   :  { %736 = vmatprep.mubr.msk.bf16.mxu1 %vm942_vm0, %v941_v0  ;;  %721 = vmatpush3.bf16.msra.mxu1 %v774_v49 }
 0x16f   :  { %722 = vmatprep.subr.bf16.mxu1 %v941_v0 }
 0x172   :  { %723 = vmatpush3.bf16.msra.mxu1 %v775_v50 }
 0x173   :  { %724 = vmatprep.subr.bf16.mxu1 %v941_v0 }
 0x176   :  { %725 = vmatpush3.bf16.msra.mxu1 %v776_v51 }
 0x177   :  { %726 = vmatprep.subr.bf16.mxu1 %v941_v0 }
 0x17a   :  { %727 = vmatpush3.bf16.msra.mxu1 %v777_v52 }
 0x17b   :  { %728 = vmatprep.subr.bf16.mxu1 %v941_v0 }
 0x17e   :  { %729 = vmatpush3.bf16.msra.mxu1 %v778_v53 }
 0x17f   :  { %730 = vmatprep.subr.bf16.mxu1 %v941_v0 }
 0x182   :  { %731 = vmatpush3.bf16.msra.mxu1 %v779_v54 }
 0x183   :  { %732 = vmatprep.subr.bf16.mxu1 %v941_v0 }
 0x186   :  { %733 = vmatpush3.bf16.msra.mxu1 %v780_v55 }
 0x187   :  { %734 = vmatprep.subr.bf16.mxu1 %v941_v0  ;;  %v615_v0 = vld [vmem:[%s1138_s8] ss:$0 sm:$0xff] }
 0x18a   :  { %735 = vmatpush3.bf16.msra.mxu1 %v781_v56 }
 0x240   :  { %v325_v39 = vpop.f32.mrb[0].mxu1 }
 0x241   :  { %v326_v40 = vadd.f32 %v595_v38, %v325_v39  ;;  %v698_v41 = vpop.f32.mrb[1].mxu1 }
 0x242   :  { %v328_v42 = vpop.f32.mrb[2].mxu1 }
 0x243   :  { %v604_v43 = vmul.f32 -1.442695, %v326_v40  ;;  %v699_v44 = vpop.f32.mrb[3].mxu1 }
 0x245   :  { %786 = vpow2.f32 %v604_v43 }
 0x24f   :  { %v787_v45 = vpop.eup %786 }
 0x250   :  { %v334_v46 = vadd.f32 1.0, %v787_v45 }
 0x252   :  { %788 = vrcp.f32 %v334_v46 }
 0x25c   :  { %v789_v47 = vpop.eup %788 }
 0x25d   :  { %v337_v48 = vpack.c.bf16 %v789_v47, %v789_v47 }
 0x25f   :  { %717 = vmatmul.mubr.bf16.vlgmr.msra.gmra.mrb[4].mxu0 %v337_v48 }
 0x332   :  { %v443_v58 = vpop.f32.mrb[4].mxu0 }
 0x333   :  { %v444_v59 = vadd.f32 %v605_v57, %v443_v58  ;;  %v718_v60 = vpop.f32.mrb[5].mxu0 }
 0x334   :  { %v446_v61 = vpop.f32.mrb[6].mxu0 }
 0x335   :  { %v614_v62 = vmul.f32 -1.442695, %v444_v59  ;;  %v719_v63 = vpop.f32.mrb[7].mxu0 }
 0x337   :  { %790 = vpow2.f32 %v614_v62 }
 0x341   :  { %v791_v1 = vpop.eup %790 }
 0x342   :  { %v452_v2 = vadd.f32 1.0, %v791_v1 }
 0x344   :  { %792 = vrcp.f32 %v452_v2 }
 0x34e   :  { %v793_v3 = vpop.eup %792 }
 0x34f   :  { %v455_v4 = vpack.c.bf16 %v793_v3, %v793_v3 }
 0x351   :  { %737 = vmatmul.mubr.bf16.vlgmr.msra.gmra.mrb[4].mxu1 %v455_v4 }
 0x424   :  { %v561_v5 = vpop.f32.mrb[4].mxu1 }
 0x425   :  { %v562_v6 = vadd.f32 %v615_v0, %v561_v5  ;;  %v738_v7 = vpop.f32.mrb[5].mxu1 }
 0x426   :  { %v564_v8 = vpop.f32.mrb[6].mxu1 }
 0x427   :  { %567 = vst [vmem:[#allocation11] sm:$0xff] %v562_v6  ;;  %v739_v9 = vpop.f32.mrb[7].mxu1 }
 0x428   :  { %915 = shalt.err (!%p912_p2)
}
 0x429   :  { %s916_s8 = scalar_lea.hbm %s1139_s9, 128 }
 0x42a   :  { %p917_p3 = scmp.ne.s32.totalorder %s1139_s9, %s916_s8  ;;  %p920_p4 = scmp.lt.u32.totalorder %s916_s8, %s1139_s9 }
 0x42c   :  { %p922_p5 = pnand %p920_p4, %p917_p3 }
 0x42e   :  { %925 = shalt.err (!%p922_p5)
}
 0x42f   :  { %577 = dma.vmem_to_hbm [thread:$0]  %s575_s12, 128, %s1139_s9, [#allocation4]  }
 0x430   :  { %932 = dma.done.wait [#allocation4], 128  }
 0x431   :  { %933 = vsyncadd [#allocation4], 4294967168 }
 0x432   :  { %581 = vsyncpa [#allocation3], 1 }
 0x433   :  { %582 = vsyncpa [#allocation6], 1 }
 0x434   :  { %583 = vsyncpa [#allocation9], 1 }
 0x435   :  { %584 = vsyncpa [#allocation4], 1 }

</bundles_post_ra>
